<compile_context>
chip_gen: v7x
topology: tpu7x:2x2x1
jax: 0.10.0
libtpu: 0.0.40
codegen_flags: <defaults>
</compile_context>

<pallas_src>
import jax
import jax.numpy as jnp
from jax.experimental import pallas as pl
from jax.experimental.pallas import tpu as pltpu


def _outconv_kernel(x_ref, w_ref, b_ref, o_ref):
    # x_ref: (Cin, T)  pixel tile, pixels in the lane dimension
    # w_ref: (Cout, Cin) weights (resident every grid step)
    # b_ref: (Cout, 1)  bias
    # o_ref: (Cout, T)
    o_ref[...] = (
        jnp.dot(w_ref[...], x_ref[...], preferred_element_type=jnp.float32)
        + b_ref[...]
    ).astype(o_ref.dtype)


def out_conv(x_nchw, w_oihw, bias, *, target_step_bytes=6 << 20):
    """1x1 conv: x (N, Cin, H, W) f32, w (Cout, Cin, 1, 1), bias (Cout,).

    Returns (N, Cout, H, W) f32, matching PyTorch nn.Conv2d(kernel_size=1).
    """
    N, Cin, H, W = x_nchw.shape
    Cout = w_oihw.shape[0]
    HW = H * W

    # NCHW-native views: pure metadata reshapes, no transpose / HBM passes.
    x3 = x_nchw.reshape(N, Cin, HW).astype(jnp.float32)
    w2 = w_oihw.reshape(Cout, Cin).astype(jnp.float32)
    b2 = bias.reshape(Cout, 1).astype(jnp.float32)

    # Lane tile: as many pixels as the per-step byte budget allows, rounded to
    # a multiple of 128 lanes (or the full row if it already fits).
    bytes_per_pixel = 4 * (Cin + Cout)
    t_hw = max(128, (target_step_bytes // bytes_per_pixel) // 128 * 128)
    if t_hw >= HW:
        t_hw = HW  # full last dim is always a legal block
    n_hw_blocks = pl.cdiv(HW, t_hw)

    # VMEM actually needed: double-buffered in/out tiles + tiny resident
    # weights/bias + headroom.  Capped at the 32 MiB default (v7x-safe).
    vmem_need = (
        2 * (Cin + Cout) * t_hw * 4
        + 2 * (Cout * Cin + Cout) * 4
        + (2 << 20)
    )
    vmem_limit = min(32 << 20, max(vmem_need, 4 << 20))

    cost = pl.CostEstimate(
        flops=2 * N * HW * Cin * Cout,
        transcendentals=0,
        bytes_accessed=4 * (N * Cin * HW + Cout * Cin + Cout + N * Cout * HW),
    )

    out3 = pl.pallas_call(
        _outconv_kernel,
        out_shape=jax.ShapeDtypeStruct((N, Cout, HW), jnp.float32),
        grid_spec=pltpu.PrefetchScalarGridSpec(
            num_scalar_prefetch=0,
            grid=(N, n_hw_blocks),
            in_specs=[
                pl.BlockSpec((None, Cin, t_hw), lambda n, j: (n, 0, j)),
                pl.BlockSpec((Cout, Cin), lambda n, j: (0, 0)),
                pl.BlockSpec((Cout, 1), lambda n, j: (0, 0)),
            ],
            out_specs=pl.BlockSpec((None, Cout, t_hw), lambda n, j: (n, 0, j)),
        ),
        compiler_params=pltpu.CompilerParams(
            dimension_semantics=("parallel", "parallel"),
            vmem_limit_bytes=vmem_limit,
        ),
        cost_estimate=cost,
    )(x3, w2, b2)

    # Free reshape back to NCHW.
    return out3.reshape(N, Cout, H, W)


def _reference(x, w, b):
    """Pure-JAX reference mirroring PyTorch Conv2d(kernel_size=1) forward."""
    y = jax.lax.conv_general_dilated(
        x, w, window_strides=(1, 1), padding="VALID",
        dimension_numbers=("NCHW", "OIHW", "NCHW"))
    return y + b.reshape(1, -1, 1, 1)


if __name__ == "__main__":
    key = jax.random.PRNGKey(0)
    N, Cin, Cout, H, W = 2, 4, 2, 16, 16  # OutConv: in_channels=4 -> n_classes=2

    k = jax.random.split(key, 3)
    x = jax.random.normal(k[0], (N, Cin, H, W), jnp.float32)
    w = jax.random.normal(k[1], (Cout, Cin, 1, 1), jnp.float32) * 0.5  # OIHW
    b = jax.random.normal(k[2], (Cout,), jnp.float32) * 0.1

    out = out_conv(x, w, b)
    out = jax.block_until_ready(out)

    ref = _reference(x, w, b)
    assert out.shape == (N, Cout, H, W)
    assert jnp.allclose(out, ref, atol=1e-4, rtol=1e-4), (
        float(jnp.max(jnp.abs(out - ref))))

    print("KERNEL_OK")
</pallas_src>

<mosaic_0001>
module attributes {stable_mosaic.version = 11 : i64} {
  func.func @_outconv_kernel(%arg0: i32, %arg1: i32, %arg2: memref<1x4x256xf32, #tpu.memory_space<vmem>>, %arg3: memref<2x4xf32, #tpu.memory_space<vmem>>, %arg4: memref<2x1xf32, #tpu.memory_space<vmem>>, %arg5: memref<1x2x256xf32, #tpu.memory_space<vmem>>) attributes {dimension_semantics = [#tpu.dimension_semantics<parallel>, #tpu.dimension_semantics<parallel>], iteration_bounds = array<i64: 2, 1>, scalar_prefetch = 0 : i64, scratch_operands = 0 : i64, tpu.core_type = #tpu.core_type<tc>, window_params = [{transform_indices = @transform_0, window_bounds = array<i64: 1, 4, 256>}, {pipeline_mode = #tpu.pipeline_mode<synchronous>, transform_indices = @transform_1, window_bounds = array<i64: 2, 4>}, {pipeline_mode = #tpu.pipeline_mode<synchronous>, transform_indices = @transform_2, window_bounds = array<i64: 2, 1>}, {transform_indices = @transform_3, window_bounds = array<i64: 1, 2, 256>}]} {
    %c0 = arith.constant 0 : index
    %c0_0 = arith.constant 0 : index
    %0 = vector.load %arg3[%c0, %c0_0] : memref<2x4xf32, #tpu.memory_space<vmem>>, vector<2x4xf32>
    %c0_1 = arith.constant 0 : index
    %c0_2 = arith.constant 0 : index
    %c0_3 = arith.constant 0 : index
    %1 = vector.load %arg2[%c0_1, %c0_2, %c0_3] : memref<1x4x256xf32, #tpu.memory_space<vmem>>, vector<1x4x256xf32>
    %2 = vector.shape_cast %1 : vector<1x4x256xf32> to vector<4x256xf32>
    %cst = arith.constant dense<0.000000e+00> : vector<2x256xf32>
    %3 = tpu.matmul %0, %2, %cst {dimension_numbers = #tpu.dot_dimension_numbers<[1], [0], [0], [1], [0, 0, 1, 1], [], []>} : vector<2x4xf32>, vector<4x256xf32>, vector<2x256xf32> -> vector<2x256xf32>
    %c0_4 = arith.constant 0 : index
    %c0_5 = arith.constant 0 : index
    %4 = vector.load %arg4[%c0_4, %c0_5] : memref<2x1xf32, #tpu.memory_space<vmem>>, vector<2x1xf32>
    %5 = vector.broadcast %4 : vector<2x1xf32> to vector<2x256xf32>
    %6 = arith.addf %3, %5 : vector<2x256xf32>
    %c0_6 = arith.constant 0 : index
    %c0_7 = arith.constant 0 : index
    %c0_8 = arith.constant 0 : index
    %7 = vector.load %arg5[%c0_6, %c0_7, %c0_8] : memref<1x2x256xf32, #tpu.memory_space<vmem>>, vector<1x2x256xf32>
    %8 = vector.shape_cast %7 : vector<1x2x256xf32> to vector<2x256xf32>
    %9 = vector.shape_cast %6 : vector<2x256xf32> to vector<1x2x256xf32>
    tpu.vector_store %arg5[%c0_6, %c0_7, %c0_8], %9 {strides = array<i32>} : memref<1x2x256xf32, #tpu.memory_space<vmem>>, vector<1x2x256xf32>,
    return
  }
  func.func @transform_0(%arg0: i32, %arg1: i32) -> (i32, i32, i32) {
    %c0_i32 = arith.constant 0 : i32
    %c0_i32_0 = arith.constant 0 : i32
    return %arg0, %c0_i32, %arg1 : i32, i32, i32
  }
  func.func @transform_1(%arg0: i32, %arg1: i32) -> (i32, i32) {
    %c0_i32 = arith.constant 0 : i32
    %c0_i32_0 = arith.constant 0 : i32
    %c0_i32_1 = arith.constant 0 : i32
    return %c0_i32, %c0_i32_0 : i32, i32
  }
  func.func @transform_2(%arg0: i32, %arg1: i32) -> (i32, i32) {
    %c0_i32 = arith.constant 0 : i32
    %c0_i32_0 = arith.constant 0 : i32
    %c0_i32_1 = arith.constant 0 : i32
    return %c0_i32, %c0_i32_0 : i32, i32
  }
  func.func @transform_3(%arg0: i32, %arg1: i32) -> (i32, i32, i32) {
    %c0_i32 = arith.constant 0 : i32
    %c0_i32_0 = arith.constant 0 : i32
    return %arg0, %c0_i32, %arg1 : i32, i32, i32
  }
}

</mosaic_0001>

<bundles_post_ra>
// kernel: tpu_custom_call.1
= control target key start
LH: loop header
LB: loop body
LE: loop exit
PB: predicated region body
PF: predicated region fallthrough
CT: control target
= control target key end

     0   :  { %8 = vsyncpa [#allocation3], 0  ;;  %s814_s0 = inlined_call_operand.hbm [shape: f32[2,4,256], index: 0, kind: input, shape index: {}]   ;;  %s815_s1 = inlined_call_operand.vmem [shape: f32[2,4], index: 1, kind: input, shape index: {}]   ;;  %s816_s2 = inlined_call_operand.vmem [shape: f32[2,1], index: 2, kind: input, shape index: {}]   ;;  %s817_s3 = inlined_call_operand.hbm [shape: f32[2,2,256], index: 3, kind: output, shape index: {}]  }
   0x1   :  { %10 = vsyncpa [#allocation3 + $0x1], 0 }
   0x2   :  { %11 = vsyncpa [#allocation4], 0 }
   0x3   :  { %13 = vsyncpa [#allocation4 + $0x1], 0  ;;  %s635_s12 = smov 0   ;;  %s637_s13 = smov 0  }
   0x4   :  { %s639_s14 = smov 0   ;;  %s641_s15 = smov 0  }
   0x5   :  { %s643_s16 = smov 0   ;;  %s645_s17 = smov 0  }
   0x6 LB: > { %s410_s18 = sadd.s32 4294967295, %s609_s17   ;;  %s411_s19 = sadd.s32 4294967294, %s609_s17   ;;  %s609_s17 = sphi %s645_s17, %s19_s17   ;;  %s605_s16 = sphi %s643_s16, %s833_s16   ;;  %s601_s15 = sphi %s641_s15, %s832_s15   ;;  %s597_s14 = sphi %s639_s14, %s831_s14   ;;  %s593_s13 = sphi %s637_s13, %s830_s13   ;;  %s589_s12 = sphi %s635_s12, %s829_s12  }
   0x7   : > { %s31_s20 = sadd.s32 1, %s605_s16  ;;  %s40_s21 = sadd.s32 1, %s597_s14 }
   0x8   : > { %p33_p0 = scmp.ge.s32.totalorder %s31_s20, 2  ;;  %p47_p1 = scmp.ne.s32.totalorder %s597_s14, %s593_s13 }
   0x9   : > { %p48_p2 = scmp.eq.s32.totalorder %s609_s17, 0  ;;  %p53_p3 = scmp.ne.s32.totalorder %s593_s13, %s589_s12 }
   0xa   : > { %s835_s20 = smov (%p33_p0, %s31_s20), 0  ;;  %p54_p5 = scmp.eq.s32.totalorder %s410_s18, 0 }
   0xb   : > { %p676_p4 = por %p48_p2, %p47_p1  ;;  %s35_s23 = ssub.s32 %s605_s16, %s835_s20 }
   0xc   : > { %p121_p6 = scmp.eq.s32.totalorder %s410_s18, 1  ;;  %p38_p7 = scmp.eq.s32.totalorder %s35_s23, 0 }
   0xd   : > { %p682_p8 = por %p54_p5, %p53_p3  ;;  %p127_p10 = scmp.eq.s32.totalorder %s411_s19, 1 }
   0xe   : > { %p686_p9 = por %p121_p6, %p47_p1  ;;  %p443_p13 = scmp.lt.s32.totalorder %s609_s17, 2 }
   0xf   : > { %s691_s26 = scalar_select %p38_p7, %s597_s14, %s40_s21  }
  0x10   : > { %s821_s25 = scalar_select %p686_p9, 1, 0 }
  0x11   : > { %p693_p11 = por %p127_p10, %p53_p3  ;;  %s153_s28 = sand.u32 1, %s597_s14  }
  0x12   : > { %s414_s29 = sshll.u32 %s153_s28, 3  ;;  %s429_s30 = sshll.u32 %s605_s16, 7 }
  0x13   : > { %s822_s27 = scalar_select %p693_p11, 1, 0 }
  0x14   : > { %s704_s6 = scalar_lea.hbm %s814_s0, %s429_s30  ;;  %s157_s7 = scalar_lea.vmem [#allocation2], %s414_s29 }
  0x15   : > { %s167_s8 = sshll.u32 %s157_s7, 4  ;;  %p710_p0 = pnand %p443_p13, %p676_p4  ;;  %s706_s8 = int_to_ptr.vmem [resolvable:$true] %s167_s8 }
  0x16   : > { %s154_s10 = scalar_lea.sflag [#allocation3], %s153_s28  ;;  %s497_s11 = scalar_lea.hbm %s704_s6, 128 }
  0x17   : > { %p498_p3 = scmp.ne.s32.totalorder %s704_s6, %s497_s11  ;;  %p499_p5 = pneg %p710_p0 }
  0x18   : > { %s502_s21 = scalar_lea.hbm %s814_s0, 256  ;;  %p503_p4 = scmp.lt.u32.totalorder %s704_s6, %s814_s0 }
  0x19   : > { %p500_p6 = pnand %p499_p5, %p498_p3  ;;  %p504_p10 = scmp.lt.u32.totalorder %s502_s21, %s497_s11 }
  0x1a   : > { %p506_p12 = scmp.lt.u32.totalorder %s497_s11, %s704_s6 }
  0x1b   : > { %p501_p7 = pneg %p500_p6  ;;  %p505_p13 = por %p504_p10, %p503_p4 }
  0x1d   : > { %p507_p1 = por %p506_p12, %p505_p13 }
  0x1f   : > { %p508_p2 = pnand %p507_p1, %p501_p7 }
  0x21   : > { %511 = shalt.err (!%p508_p2)
}
  0x22   : > { %s512_s28 = scalar_lea.vmem %s706_s8, 128  ;;  %s611_s29 = smov [#allocation2]  }
  0x23   : > { %p513_p3 = scmp.ne.s32.totalorder %s706_s8, %s512_s28  ;;  %s517_s30 = sshll.u32 %s611_s29, 4  ;;  %s518_s30 = int_to_ptr.vmem [resolvable:$false] %s517_s30 }
  0x24   : > { %s519_s4 = scalar_lea.vmem %s518_s30, 256  ;;  %p520_p9 = scmp.lt.s32.totalorder %s706_s8, %s518_s30 }
  0x25   : > { %p515_p6 = pnand %p513_p3, %p499_p5  ;;  %p521_p4 = scmp.lt.s32.totalorder %s519_s4, %s512_s28 }
  0x27   : > { %p516_p11 = pneg %p515_p6  ;;  %p522_p10 = por %p521_p4, %p520_p9 }
  0x29   : > { %p523_p12 = pnand %p522_p10, %p516_p11 }
  0x2b   : > { %526 = shalt.err (!%p523_p12)
}
  0x2c   : > { %438 = dma.hbm_to_vmem [thread:$0]  (!%p710_p0), %s704_s6, 128, %s706_s8, %s154_s10  }
  0x2d   : > { %p824_p1 = scmp.lt.s32.totalorder %s609_s17, 3  ;;  %p825_p2 = scmp.ge.s32.totalorder %s609_s17, 1 }
  0x2f   : > { %p173_p5 = pnand %p825_p2, %p824_p1 }
  0x30   : > { %s746_s5 = sand.u32 (!%p173_p5), 1, %s593_s13  }
  0x31   : > { %176 = sbr.rel (%p173_p5) target bundleno = 293 (0x125), region = 32  ;;  %s418_s7 = sshll.u32 (!%p173_p5), %s746_s5, 3 }
  0x32   : > { %s179_s11 = scalar_lea.sflag (!%p173_p5), [#allocation3], %s746_s5  ;;  %s182_s18 = scalar_lea.vmem (!%p173_p5), [#allocation2], %s418_s7 }
  0x38   : > { %580 = dma.done.wait (%p682_p8), %s179_s11, 128  }
  0x39   : > { %582 = vsyncadd (%p682_p8), %s179_s11, 4294967168  ;;  %v612_v0 = vmov 0.0   ;;  %v613_v1 = vmov 0   ;;  %v208_v2 = vld [vmem:[%s182_s18] sm:$0xff]  ;;  %vm221_vm0 = vcmask 1043456   ;;  %vm217_vm1 = vcmask 31744  }
  0x3a   : > { %290 = vmatprep.mubr.f32.mxu0 %v612_v0  ;;  %495 = vset.pattern.permute.xlu0 %v613_v1  ;;  %v209_v3 = vld [vmem:[%s816_s2] sm:$0x3]  ;;  %v216_v4 = vcombine.high %v208_v2, %v208_v2  ;;  %s419_s24 = sshll.u32 %s746_s5, 2  ;;  %s430_s19 = sshll.u32 %s601_s15, 6 }
  0x3b   : > { %212 = vperm.xlu0 %495, %v209_v3   ;;  %v207_v5 = vld [vmem:[%s815_s1] sm:$0x3]  ;;  %s204_s21 = scalar_lea.vmem [#allocation5], %s419_s24  ;;  %s765_s29 = scalar_lea.hbm %s817_s3, %s430_s19 }
  0x3c   : > { %420 = vmatprep.subr.msk.mxu0 %vm221_vm0, %v216_v4  ;;  %s326_s22 = sshll.u32 %s204_s21, 4  ;;  %s310_s30 = scalar_lea.sflag [#allocation4], %s746_s5  ;;  %s767_s22 = int_to_ptr.vmem [resolvable:$true] %s326_s22 }
  0x3d   : > { %421 = vmatpush1.msk.msra.mxu0 %vm221_vm0, %v208_v2  ;;  %s527_s4 = scalar_lea.vmem %s767_s22, 64  ;;  %p826_p9 = scmp.ne.s32.totalorder %s821_s25, 0 }
  0x3e   : > { %422 = vmatmul.mubr.msk.f32.vlgmr.msra.gmra.mrb[0].mxu0 %vm217_vm1, %v207_v5  ;;  %p528_p8 = scmp.ne.s32.totalorder %s767_s22, %s527_s4  ;;  %s614_s15 = smov [#allocation5]  }
  0x3f   : > { %s531_s7 = sshll.u32 %s614_s15, 4  ;;  %s532_s7 = int_to_ptr.vmem [resolvable:$false] %s531_s7 }
  0x40   : > { %p529_p11 = pnand %p528_p8, %p826_p9  ;;  %s533_s11 = scalar_lea.vmem %s532_s7, 128 }
  0x41   : > { %p534_p7 = scmp.lt.s32.totalorder %s767_s22, %s532_s7  ;;  %p535_p13 = scmp.lt.s32.totalorder %s533_s11, %s527_s4 }
  0x42   : > { %p530_p0 = pneg %p529_p11 }
  0x43   : > { %p536_p3 = por %p535_p13, %p534_p7 }
  0x45   : > { %p537_p6 = pnand %p536_p3, %p530_p0 }
  0xba   : > { %v213_v6 = vpop.permute.xlu0 %212 }
 0x111   : > { %v292_v7 = vpop.f32.mrb[0].mxu0 }
 0x112   : > { %v293_v8 = vadd.f32 %v292_v7, %v213_v6  ;;  %v294_v9 = vpop.f32.mrb[1].mxu0 }
 0x113   : > { %v295_v10 = vadd.f32 %v294_v9, %v213_v6 }
 0x115   : > { %v299_v11 = vcombine.low %v293_v8, %v295_v10 }
 0x117   : > { %423 = vst.sshfl [vmem:[%s204_s21] sm:$0x33 pattern:$0x76325410] %v299_v11 }
 0x118   : > { %540 = shalt.err (!%p537_p6)
}
 0x119   : > { %s541_s5 = scalar_lea.hbm %s765_s29, 64  ;;  %s545_s8 = scalar_lea.hbm %s817_s3, 128 }
 0x11a   : > { %p542_p4 = scmp.ne.s32.totalorder %s765_s29, %s541_s5  ;;  %p546_p1 = scmp.lt.u32.totalorder %s765_s29, %s817_s3 }
 0x11b   : > { %p547_p2 = scmp.lt.u32.totalorder %s545_s8, %s541_s5  ;;  %p549_p8 = scmp.lt.u32.totalorder %s541_s5, %s765_s29 }
 0x11c   : > { %p543_p10 = pnand %p542_p4, %p826_p9 }
 0x11d   : > { %p548_p5 = por %p547_p2, %p546_p1 }
 0x11e   : > { %p544_p12 = pneg %p543_p10 }
 0x11f   : > { %p550_p11 = por %p549_p8, %p548_p5 }
 0x121   : > { %p551_p0 = pnand %p550_p11, %p544_p12 }
 0x123   : > { %554 = shalt.err (!%p551_p0)
}
 0x124   : > { %433 = dma.vmem_to_hbm [thread:$0]  (%p826_p9), %s767_s22, 64, %s765_s29, %s310_s30  }
 0x125 PF: > { %s338_s24 = sand.u32 1, %s589_s12   ;;  %p827_p7 = scmp.ne.s32.totalorder %s822_s27, 0 }
 0x126   : > { %p828_p13 = scmp.ge.s32.totalorder %s609_s17, 2  ;;  %s339_s19 = scalar_lea.sflag [#allocation4], %s338_s24 }
 0x128   : > { %p440_p3 = pnand %p828_p13, %p827_p7 }
 0x12a   : > { %584 = dma.done.wait (!%p440_p3), %s339_s19, 64  }
 0x12b   : > { %586 = vsyncadd (!%p440_p3), %s339_s19, 4294967232  ;;  %s19_s17 = sadd.s32 1, %s609_s17   ;;  %s829_s12 = smov %s593_s13 }
 0x12c   : > { %p16_p6 = scmp.ge.s32.totalorder %s19_s17, 4   ;;  %s830_s13 = smov %s597_s14 }
 0x12d   : > { %s831_s14 = smov %s691_s26  ;;  %s832_s15 = smov %s605_s16 }
 0x12e   : > { %s833_s16 = smov %s835_s20  ;;  %18 = sbr.rel (!%p16_p6) target bundleno = 6 (0x6), region = 77 }
 0x135   :  { %344 = vsyncpa [#allocation3], 1 }
 0x136   :  { %346 = vsyncpa [#allocation3 + $0x1], 1 }
 0x137   :  { %347 = vsyncpa [#allocation4], 1 }
 0x138   :  { %349 = vsyncpa [#allocation4 + $0x1], 1 }

</bundles_post_ra>
